<compile_context>
chip_gen: v5e
topology: v5e:2x2
jax: 0.10.0
libtpu: 0.0.40
codegen_flags: <defaults>
</compile_context>

<pallas_src>
import functools

import jax
import jax.numpy as jnp
from jax import lax
from jax.experimental import pallas as pl
from jax.experimental.pallas import tpu as pltpu


def _round_up(x, m):
    return -(-x // m) * m


def _vmem_capacity_bytes():
    try:
        info = pltpu.get_tpu_info()
        cap = getattr(info, "vmem_capacity_bytes", None)
        if cap:
            return int(cap)
    except Exception:
        pass
    return 64 * 1024 * 1024   # conservative default (v7x per-TC VMEM)


def _num_core_splits():
    """Row-axis shards: 2 on multi-TensorCore chips (v7x), 1 otherwise."""
    try:
        info = pltpu.get_tpu_info()
        for name in ("num_tensorcores", "tensorcore_count", "num_cores", "core_count"):
            v = getattr(info, name, None)
            if v:
                return int(max(1, min(int(v), 2)))
    except Exception:
        pass
    return 1


def _auto_tile_n(n, d, k):
    """Largest row tile keeping double-buffered input tiles inside VMEM."""
    cap = _vmem_capacity_bytes()
    budget = int(cap * 0.45)                       # headroom for outputs / temps
    d_pad = _round_up(max(d, 128), 128)
    k_pad = _round_up(max(k, 128), 128)
    bytes_per_row = (2 * d_pad + k_pad) * 4        # x, tx, g (f32 worst case, lane padded)
    tile = budget // (2 * bytes_per_row)           # 2x: double buffering
    tile = max(8, (tile // 8) * 8)
    tile = min(tile, 4096)                         # raised cap (review: v7x)
    return int(tile)


def _make_kernel(n_rows, tile_n, tiles_per_split, d, k, orth):
    def kernel(x_ref, tx_ref, g_ref, e1_ref, gsum_ref, gsq_ref, *rest):
        gg_ref = rest[0] if rest else None
        # program_id only at kernel top level (never inside pl.when bodies).
        c = pl.program_id(0)
        i = pl.program_id(1)
        tile_idx = c * tiles_per_split + i            # unclamped
        rows_valid = n_rows - tile_idx * tile_n       # <= 0 for fully-OOB steps

        @pl.when(i == 0)
        def _init():
            e1_ref[...] = jnp.zeros_like(e1_ref)
            gsum_ref[...] = jnp.zeros_like(gsum_ref)
            gsq_ref[...] = jnp.zeros_like(gsq_ref)
            if gg_ref is not None:
                gg_ref[...] = jnp.zeros_like(gg_ref)

        # ---- reconstruction error: sum over rows of (x - tx)^2 (masked) ----
        mask_x = lax.broadcasted_iota(jnp.int32, (tile_n, d), 0) < rows_valid
        xf = x_ref[...].astype(jnp.float32)
        txf = tx_ref[...].astype(jnp.float32)
        diff = jnp.where(mask_x, xf - txf, 0.0)
        e1_ref[...] += jnp.sum(diff * diff, axis=0, keepdims=True)

        # ---- assignment statistics: sum g, sum g^2, (non-orth) g^T g ----
        mask_g = lax.broadcasted_iota(jnp.int32, (tile_n, k), 0) < rows_valid
        g = jnp.where(mask_g, g_ref[...], 0)          # native dtype, masked rows = 0
        gf = g.astype(jnp.float32)
        gsum_ref[...] += jnp.sum(gf, axis=0, keepdims=True)
        gsq_ref[...] += jnp.sum(gf * gf, axis=0, keepdims=True)

        if gg_ref is not None:
            # g^T g : contract the row axis of both operands (no explicit transpose).
            gg_ref[...] += lax.dot_general(
                g, g, (((0,), (0,)), ((), ())),
                preferred_element_type=jnp.float32)

    return kernel


@functools.partial(jax.jit, static_argnames=("orth", "tile_n"))
def _cm_loss_stats(x, tx, g, *, orth, tile_n=None):
    """Per-core-split raw statistics.

    Returns (e1v (nc,1,d), gsum (nc,1,k), gsq (nc,1,k)[, gg (nc,k,k)]).
    """
    n, d = x.shape
    k = g.shape[1]

    n_cap = max(8, (n // 8) * 8)
    if tile_n is None:
        tile_n = _auto_tile_n(n, d, k)
    tile_n = max(8, _round_up(int(tile_n), 8))
    tile_n = min(tile_n, n_cap)

    total_tiles = -(-n // tile_n)
    nc = max(1, min(_num_core_splits(), total_tiles))
    tiles_per_split = -(-total_tiles // nc)
    last_tile = total_tiles - 1

    # Clamp to the last in-bounds block; duplicate steps are fully masked
    # inside the kernel (rows_valid <= 0) so they contribute exactly zero.
    def row_map(c, i):
        return (jnp.minimum(c * tiles_per_split + i, last_tile), 0)

    in_specs = [
        pl.BlockSpec((tile_n, d), row_map),   # x
        pl.BlockSpec((tile_n, d), row_map),   # tx
        pl.BlockSpec((tile_n, k), row_map),   # g
    ]
    out_shape = [
        jax.ShapeDtypeStruct((nc, 1, d), jnp.float32),   # sum_n (x-tx)^2 per split
        jax.ShapeDtypeStruct((nc, 1, k), jnp.float32),   # sum_n g       per split
        jax.ShapeDtypeStruct((nc, 1, k), jnp.float32),   # sum_n g^2     per split
    ]
    out_specs = [
        pl.BlockSpec((None, 1, d), lambda c, i: (c, 0, 0)),
        pl.BlockSpec((None, 1, k), lambda c, i: (c, 0, 0)),
        pl.BlockSpec((None, 1, k), lambda c, i: (c, 0, 0)),
    ]
    if not orth:
        out_shape.append(jax.ShapeDtypeStruct((nc, k, k), jnp.float32))  # g^T g per split
        out_specs.append(pl.BlockSpec((None, k, k), lambda c, i: (c, 0, 0)))

    itemsize = jnp.dtype(x.dtype).itemsize
    flops = 3 * n * d + 4 * n * k + (0 if orth else 2 * n * k * k)
    cost = pl.CostEstimate(
        flops=int(flops),
        transcendentals=0,
        bytes_accessed=int(itemsize * (2 * n * d + n * k)),
    )

    cap = _vmem_capacity_bytes()
    d_pad = _round_up(max(d, 128), 128)
    k_pad = _round_up(max(k, 128), 128)
    working = 2 * tile_n * (2 * d_pad + k_pad) * 4            # double-buffered input tiles
    working += (d_pad + 2 * k_pad + max(k, 8) * k_pad) * 4    # resident output blocks
    vmem_limit = int(min(max(2 * working + (8 << 20), 32 << 20), int(cap * 0.75)))

    compiler_params = pltpu.CompilerParams(
        dimension_semantics=("parallel", "arbitrary"),
        vmem_limit_bytes=vmem_limit,
    )

    kernel = _make_kernel(n, tile_n, tiles_per_split, d, k, orth)
    return pl.pallas_call(
        kernel,
        grid=(nc, tiles_per_split),
        in_specs=in_specs,
        out_specs=tuple(out_specs),
        out_shape=tuple(out_shape),
        compiler_params=compiler_params,
        cost_estimate=cost,
    )(x, tx, g)


class ClusteringModuleLoss:
    """JAX / Pallas port of Clustering_Module_Loss."""

    def __init__(self, num_clusters, alpha=1.0, lbd=1.0, orth=False,
                 normalize=True, tile_n=None):
        if hasattr(alpha, "__iter__"):
            self.alpha = jnp.asarray(alpha, dtype=jnp.float32).reshape(num_clusters)
        else:
            self.alpha = jnp.ones((num_clusters,), jnp.float32) * float(alpha)
        self.num_clusters = num_clusters
        self.lbd = float(lbd)
        self.orth = bool(orth)
        self.normalize = bool(normalize)
        self.tile_n = tile_n

    def __call__(self, inputs, targets=None, split=False):
        x, g, tx, u = inputs
        n, d = x.shape
        k = g.shape[1]
        assert k == self.num_clusters

        stats = _cm_loss_stats(x, tx, g, orth=self.orth, tile_n=self.tile_n)
        if self.orth:
            e1v, gsum_s, gsq_s = stats
            gg = None
        else:
            e1v, gsum_s, gsq_s, gg_s = stats
            gg = jnp.sum(gg_s, axis=0)                        # (k, k)

        # Combine per-core-split partials (all linear) + tiny O(k*d) epilogue.
        e1_raw = jnp.sum(e1v)
        gsum = jnp.sum(gsum_s[:, 0, :], axis=0)               # (k,) = sum_n g
        gsq = jnp.sum(gsq_s[:, 0, :], axis=0)                 # (k,) = sum_n g^2

        uf = u.astype(jnp.float32)
        nd = float(n * d) if self.normalize else 1.0
        e1 = e1_raw / nd

        if self.orth:
            e2 = jnp.sum(gsum - gsq) / nd                     # sum g*(1-g)
            uu = uf @ uf.T
            e3 = jnp.sum(jnp.square(uu - jnp.eye(k, dtype=jnp.float32))) * self.lbd
        else:
            usq = jnp.sum(uf * uf, axis=1)                    # (k,)
            e2 = jnp.sum((gsum - gsq) * usq) / nd
            uu = uf @ uf.T
            e3 = -jnp.sum(gg * uu * (1.0 - jnp.eye(k, dtype=jnp.float32))) / nd

        lmg = jnp.log(gsum / float(n) + 1e-10)
        e4 = jnp.sum(lmg * (1.0 - self.alpha))

        if split:
            nd2 = 1.0 if self.normalize else float(n * d)
            return jnp.stack((e1 / nd2, e2 / nd2,
                              e3 / (1.0 if self.orth else nd2), e4))
        return e1 + e2 + e3 + e4


def _reference_loss(x, g, tx, u, alpha, lbd, orth, normalize, split=False):
    """Pure-JAX reference mirroring the PyTorch forward (for verification)."""
    n, d = x.shape
    k = g.shape[1]
    nd = n * d if normalize else 1.0
    e1 = jnp.sum(jnp.square(x - tx)) / nd
    if orth:
        e2 = jnp.sum(g * (1 - g)) / nd
        uu = u @ u.T
        e3 = jnp.sum(jnp.square(uu - jnp.eye(k))) * lbd
    else:
        e2 = jnp.sum(jnp.sum(g * (1 - g), 0) * jnp.sum(jnp.square(u), 1)) / nd
        gg = g.T @ g
        uu = u @ u.T
        gu = gg * uu * (1 - jnp.eye(k))
        e3 = -jnp.sum(gu) / nd
    lmg = jnp.log(jnp.mean(g, 0) + 1e-10)
    e4 = jnp.sum(lmg * (1 - alpha.reshape(-1)))
    if split:
        nd2 = 1.0 if normalize else n * d
        return jnp.stack((e1 / nd2, e2 / nd2, e3 / (1 if orth else nd2), e4))
    return e1 + e2 + e3 + e4


if __name__ == "__main__":
    # n is NOT a multiple of the tile so in-kernel masking of the ragged last
    # tile and the multi-step accumulation over both grid axes are exercised.
    n, d, k = 500, 128, 16

    key = jax.random.PRNGKey(0)
    kx, ktx, kg, ku = jax.random.split(key, 4)
    x = jax.random.normal(kx, (n, d), dtype=jnp.float32)
    tx = x + 0.1 * jax.random.normal(ktx, (n, d), dtype=jnp.float32)
    g = jax.nn.softmax(jax.random.normal(kg, (n, k), dtype=jnp.float32), axis=-1)
    u = jax.random.normal(ku, (k, d), dtype=jnp.float32)

    alpha_vec = 0.5 + 0.05 * jnp.arange(k, dtype=jnp.float32)

    loss_mod = ClusteringModuleLoss(k, alpha=alpha_vec, lbd=1.0, orth=False,
                                    normalize=True, tile_n=128)   # multi-tile path
    loss_orth = ClusteringModuleLoss(k, alpha=alpha_vec, lbd=0.7, orth=True,
                                     normalize=True, tile_n=None)  # auto tile path

    out = jax.block_until_ready(loss_mod((x, g, tx, u)))
    out_split = jax.block_until_ready(loss_mod((x, g, tx, u), split=True))
    out_orth = jax.block_until_ready(loss_orth((x, g, tx, u)))

    ref = _reference_loss(x, g, tx, u, alpha_vec, 1.0, False, True, split=False)
    ref_split = _reference_loss(x, g, tx, u, alpha_vec, 1.0, False, True, split=True)
    ref_orth = _reference_loss(x, g, tx, u, alpha_vec, 0.7, True, True, split=False)

    assert jnp.allclose(out, ref, rtol=1e-4, atol=1e-4), (out, ref)
    assert jnp.allclose(out_split, ref_split, rtol=1e-4, atol=1e-4), (out_split, ref_split)
    assert jnp.allclose(out_orth, ref_orth, rtol=1e-4, atol=1e-4), (out_orth, ref_orth)

    print("KERNEL_OK")
</pallas_src>

<mosaic_0001>
module attributes {stable_mosaic.version = 11 : i64} {
  func.func @kernel(%arg0: i32, %arg1: i32, %arg2: memref<128x128xf32, #tpu.memory_space<vmem>>, %arg3: memref<128x128xf32, #tpu.memory_space<vmem>>, %arg4: memref<128x16xf32, #tpu.memory_space<vmem>>, %arg5: memref<1x1x128xf32, #tpu.memory_space<vmem>>, %arg6: memref<1x1x16xf32, #tpu.memory_space<vmem>>, %arg7: memref<1x1x16xf32, #tpu.memory_space<vmem>>, %arg8: memref<1x16x16xf32, #tpu.memory_space<vmem>>) attributes {dimension_semantics = [#tpu.dimension_semantics<parallel>, #tpu.dimension_semantics<arbitrary>], iteration_bounds = array<i64: 1, 4>, scalar_prefetch = 0 : i64, scratch_operands = 0 : i64, tpu.core_type = #tpu.core_type<tc>, window_params = [{transform_indices = @transform_0, window_bounds = array<i64: 128, 128>}, {transform_indices = @transform_1, window_bounds = array<i64: 128, 128>}, {transform_indices = @transform_2, window_bounds = array<i64: 128, 16>}, {transform_indices = @transform_3, window_bounds = array<i64: 1, 1, 128>}, {transform_indices = @transform_4, window_bounds = array<i64: 1, 1, 16>}, {transform_indices = @transform_5, window_bounds = array<i64: 1, 1, 16>}, {transform_indices = @transform_6, window_bounds = array<i64: 1, 16, 16>}]} {
    %c4_i32 = arith.constant 4 : i32
    %0 = arith.muli %arg0, %c4_i32 : i32
    %1 = arith.addi %0, %arg1 : i32
    %c128_i32 = arith.constant 128 : i32
    %2 = arith.muli %1, %c128_i32 : i32
    %c500_i32 = arith.constant 500 : i32
    %3 = arith.subi %c500_i32, %2 : i32
    %c0_i32 = arith.constant 0 : i32
    %4 = arith.cmpi eq, %arg1, %c0_i32 : i32
    %5 = arith.extui %4 : i1 to i32
    %c0_i32_0 = arith.constant 0 : i32
    %6 = arith.cmpi ne, %5, %c0_i32_0 : i32
    scf.if %6 {
      %cst_35 = arith.constant 0.000000e+00 : f32
      %55 = vector.broadcast %cst_35 : f32 to vector<1x128xf32>
      %c0_36 = arith.constant 0 : index
      %c0_37 = arith.constant 0 : index
      %c0_38 = arith.constant 0 : index
      %56 = vector.load %arg5[%c0_36, %c0_37, %c0_38] : memref<1x1x128xf32, #tpu.memory_space<vmem>>, vector<1x1x128xf32>
      %57 = vector.shape_cast %56 : vector<1x1x128xf32> to vector<1x128xf32>
      %58 = vector.shape_cast %55 : vector<1x128xf32> to vector<1x1x128xf32>
      tpu.vector_store %arg5[%c0_36, %c0_37, %c0_38], %58 {strides = array<i32>} : memref<1x1x128xf32, #tpu.memory_space<vmem>>, vector<1x1x128xf32>,
      %cst_39 = arith.constant 0.000000e+00 : f32
      %59 = vector.broadcast %cst_39 : f32 to vector<1x16xf32>
      %c0_40 = arith.constant 0 : index
      %c0_41 = arith.constant 0 : index
      %c0_42 = arith.constant 0 : index
      %60 = vector.load %arg6[%c0_40, %c0_41, %c0_42] : memref<1x1x16xf32, #tpu.memory_space<vmem>>, vector<1x1x16xf32>
      %61 = vector.shape_cast %60 : vector<1x1x16xf32> to vector<1x16xf32>
      %62 = vector.shape_cast %59 : vector<1x16xf32> to vector<1x1x16xf32>
      tpu.vector_store %arg6[%c0_40, %c0_41, %c0_42], %62 {strides = array<i32>} : memref<1x1x16xf32, #tpu.memory_space<vmem>>, vector<1x1x16xf32>,
      %cst_43 = arith.constant 0.000000e+00 : f32
      %63 = vector.broadcast %cst_43 : f32 to vector<1x16xf32>
      %c0_44 = arith.constant 0 : index
      %c0_45 = arith.constant 0 : index
      %c0_46 = arith.constant 0 : index
      %64 = vector.load %arg7[%c0_44, %c0_45, %c0_46] : memref<1x1x16xf32, #tpu.memory_space<vmem>>, vector<1x1x16xf32>
      %65 = vector.shape_cast %64 : vector<1x1x16xf32> to vector<1x16xf32>
      %66 = vector.shape_cast %63 : vector<1x16xf32> to vector<1x1x16xf32>
      tpu.vector_store %arg7[%c0_44, %c0_45, %c0_46], %66 {strides = array<i32>} : memref<1x1x16xf32, #tpu.memory_space<vmem>>, vector<1x1x16xf32>,
      %cst_47 = arith.constant 0.000000e+00 : f32
      %67 = vector.broadcast %cst_47 : f32 to vector<16x16xf32>
      %c0_48 = arith.constant 0 : index
      %c0_49 = arith.constant 0 : index
      %c0_50 = arith.constant 0 : index
      %68 = vector.load %arg8[%c0_48, %c0_49, %c0_50] : memref<1x16x16xf32, #tpu.memory_space<vmem>>, vector<1x16x16xf32>
      %69 = vector.shape_cast %68 : vector<1x16x16xf32> to vector<16x16xf32>
      %70 = vector.shape_cast %67 : vector<16x16xf32> to vector<1x16x16xf32>
      tpu.vector_store %arg8[%c0_48, %c0_49, %c0_50], %70 {strides = array<i32>} : memref<1x16x16xf32, #tpu.memory_space<vmem>>, vector<1x16x16xf32>,
    } else {
    }
    %7 = tpu.iota {dimensions = array<i32: 0>} : vector<128x128xi32>
    %8 = vector.broadcast %3 : i32 to vector<128x128xi32>
    %9 = arith.cmpi slt, %7, %8 : vector<128x128xi32>
    %c0 = arith.constant 0 : index
    %c0_1 = arith.constant 0 : index
    %10 = vector.load %arg2[%c0, %c0_1] : memref<128x128xf32, #tpu.memory_space<vmem>>, vector<128x128xf32>
    %c0_2 = arith.constant 0 : index
    %c0_3 = arith.constant 0 : index
    %11 = vector.load %arg3[%c0_2, %c0_3] : memref<128x128xf32, #tpu.memory_space<vmem>>, vector<128x128xf32>
    %12 = arith.subf %10, %11 : vector<128x128xf32>
    %cst = arith.constant 0.000000e+00 : f32
    %13 = vector.broadcast %cst : f32 to vector<128x128xf32>
    %14 = arith.select %9, %12, %13 : vector<128x128xi1>, vector<128x128xf32>
    %c0_4 = arith.constant 0 : index
    %c0_5 = arith.constant 0 : index
    %c0_6 = arith.constant 0 : index
    %15 = vector.load %arg5[%c0_4, %c0_5, %c0_6] : memref<1x1x128xf32, #tpu.memory_space<vmem>>, vector<1x1x128xf32>
    %16 = vector.shape_cast %15 : vector<1x1x128xf32> to vector<1x128xf32>
    %17 = arith.mulf %14, %14 : vector<128x128xf32>
    %cst_7 = arith.constant dense<0.000000e+00> : vector<128xf32>
    %18 = vector.multi_reduction <add>, %17, %cst_7 [0] : vector<128x128xf32> to vector<128xf32>
    %19 = vector.shape_cast %18 : vector<128xf32> to vector<1x128xf32>
    %20 = arith.addf %16, %19 : vector<1x128xf32>
    %c0_8 = arith.constant 0 : index
    %c0_9 = arith.constant 0 : index
    %c0_10 = arith.constant 0 : index
    %21 = vector.load %arg5[%c0_8, %c0_9, %c0_10] : memref<1x1x128xf32, #tpu.memory_space<vmem>>, vector<1x1x128xf32>
    %22 = vector.shape_cast %21 : vector<1x1x128xf32> to vector<1x128xf32>
    %23 = vector.shape_cast %20 : vector<1x128xf32> to vector<1x1x128xf32>
    tpu.vector_store %arg5[%c0_8, %c0_9, %c0_10], %23 {strides = array<i32>} : memref<1x1x128xf32, #tpu.memory_space<vmem>>, vector<1x1x128xf32>,
    %24 = tpu.iota {dimensions = array<i32: 0>} : vector<128x16xi32>
    %25 = vector.broadcast %3 : i32 to vector<128x16xi32>
    %26 = arith.cmpi slt, %24, %25 : vector<128x16xi32>
    %c0_11 = arith.constant 0 : index
    %c0_12 = arith.constant 0 : index
    %27 = vector.load %arg4[%c0_11, %c0_12] : memref<128x16xf32, #tpu.memory_space<vmem>>, vector<128x16xf32>
    %c0_i32_13 = arith.constant 0 : i32
    %28 = arith.sitofp %c0_i32_13 : i32 to f32
    %29 = vector.broadcast %28 : f32 to vector<128x16xf32>
    %30 = arith.select %26, %27, %29 : vector<128x16xi1>, vector<128x16xf32>
    %c0_14 = arith.constant 0 : index
    %c0_15 = arith.constant 0 : index
    %c0_16 = arith.constant 0 : index
    %31 = vector.load %arg6[%c0_14, %c0_15, %c0_16] : memref<1x1x16xf32, #tpu.memory_space<vmem>>, vector<1x1x16xf32>
    %32 = vector.shape_cast %31 : vector<1x1x16xf32> to vector<1x16xf32>
    %cst_17 = arith.constant dense<0.000000e+00> : vector<16xf32>
    %33 = vector.multi_reduction <add>, %30, %cst_17 [0] : vector<128x16xf32> to vector<16xf32>
    %34 = vector.shape_cast %33 : vector<16xf32> to vector<1x16xf32>
    %35 = arith.addf %32, %34 : vector<1x16xf32>
    %c0_18 = arith.constant 0 : index
    %c0_19 = arith.constant 0 : index
    %c0_20 = arith.constant 0 : index
    %36 = vector.load %arg6[%c0_18, %c0_19, %c0_20] : memref<1x1x16xf32, #tpu.memory_space<vmem>>, vector<1x1x16xf32>
    %37 = vector.shape_cast %36 : vector<1x1x16xf32> to vector<1x16xf32>
    %38 = vector.shape_cast %35 : vector<1x16xf32> to vector<1x1x16xf32>
    tpu.vector_store %arg6[%c0_18, %c0_19, %c0_20], %38 {strides = array<i32>} : memref<1x1x16xf32, #tpu.memory_space<vmem>>, vector<1x1x16xf32>,
    %c0_21 = arith.constant 0 : index
    %c0_22 = arith.constant 0 : index
    %c0_23 = arith.constant 0 : index
    %39 = vector.load %arg7[%c0_21, %c0_22, %c0_23] : memref<1x1x16xf32, #tpu.memory_space<vmem>>, vector<1x1x16xf32>
    %40 = vector.shape_cast %39 : vector<1x1x16xf32> to vector<1x16xf32>
    %41 = arith.mulf %30, %30 : vector<128x16xf32>
    %cst_24 = arith.constant dense<0.000000e+00> : vector<16xf32>
    %42 = vector.multi_reduction <add>, %41, %cst_24 [0] : vector<128x16xf32> to vector<16xf32>
    %43 = vector.shape_cast %42 : vector<16xf32> to vector<1x16xf32>
    %44 = arith.addf %40, %43 : vector<1x16xf32>
    %c0_25 = arith.constant 0 : index
    %c0_26 = arith.constant 0 : index
    %c0_27 = arith.constant 0 : index
    %45 = vector.load %arg7[%c0_25, %c0_26, %c0_27] : memref<1x1x16xf32, #tpu.memory_space<vmem>>, vector<1x1x16xf32>
    %46 = vector.shape_cast %45 : vector<1x1x16xf32> to vector<1x16xf32>
    %47 = vector.shape_cast %44 : vector<1x16xf32> to vector<1x1x16xf32>
    tpu.vector_store %arg7[%c0_25, %c0_26, %c0_27], %47 {strides = array<i32>} : memref<1x1x16xf32, #tpu.memory_space<vmem>>, vector<1x1x16xf32>,
    %c0_28 = arith.constant 0 : index
    %c0_29 = arith.constant 0 : index
    %c0_30 = arith.constant 0 : index
    %48 = vector.load %arg8[%c0_28, %c0_29, %c0_30] : memref<1x16x16xf32, #tpu.memory_space<vmem>>, vector<1x16x16xf32>
    %49 = vector.shape_cast %48 : vector<1x16x16xf32> to vector<16x16xf32>
    %cst_31 = arith.constant dense<0.000000e+00> : vector<16x16xf32>
    %50 = tpu.matmul %30, %30, %cst_31 {dimension_numbers = #tpu.dot_dimension_numbers<[0], [0], [1], [1], [0, 1, 1, 1], [], []>} : vector<128x16xf32>, vector<128x16xf32>, vector<16x16xf32> -> vector<16x16xf32>
    %51 = arith.addf %49, %50 : vector<16x16xf32>
    %c0_32 = arith.constant 0 : index
    %c0_33 = arith.constant 0 : index
    %c0_34 = arith.constant 0 : index
    %52 = vector.load %arg8[%c0_32, %c0_33, %c0_34] : memref<1x16x16xf32, #tpu.memory_space<vmem>>, vector<1x16x16xf32>
    %53 = vector.shape_cast %52 : vector<1x16x16xf32> to vector<16x16xf32>
    %54 = vector.shape_cast %51 : vector<16x16xf32> to vector<1x16x16xf32>
    tpu.vector_store %arg8[%c0_32, %c0_33, %c0_34], %54 {strides = array<i32>} : memref<1x16x16xf32, #tpu.memory_space<vmem>>, vector<1x16x16xf32>,
    return
  }
  func.func @transform_0(%arg0: i32, %arg1: i32) -> (i32, i32) {
    %c4_i32 = arith.constant 4 : i32
    %0 = arith.muli %arg0, %c4_i32 : i32
    %1 = arith.addi %0, %arg1 : i32
    %c3_i32 = arith.constant 3 : i32
    %2 = arith.minsi %1, %c3_i32 : i32
    %c0_i32 = arith.constant 0 : i32
    %c0_i32_0 = arith.constant 0 : i32
    return %2, %c0_i32 : i32, i32
  }
  func.func @transform_1(%arg0: i32, %arg1: i32) -> (i32, i32) {
    %c4_i32 = arith.constant 4 : i32
    %0 = arith.muli %arg0, %c4_i32 : i32
    %1 = arith.addi %0, %arg1 : i32
    %c3_i32 = arith.constant 3 : i32
    %2 = arith.minsi %1, %c3_i32 : i32
    %c0_i32 = arith.constant 0 : i32
    %c0_i32_0 = arith.constant 0 : i32
    return %2, %c0_i32 : i32, i32
  }
  func.func @transform_2(%arg0: i32, %arg1: i32) -> (i32, i32) {
    %c4_i32 = arith.constant 4 : i32
    %0 = arith.muli %arg0, %c4_i32 : i32
    %1 = arith.addi %0, %arg1 : i32
    %c3_i32 = arith.constant 3 : i32
    %2 = arith.minsi %1, %c3_i32 : i32
    %c0_i32 = arith.constant 0 : i32
    %c0_i32_0 = arith.constant 0 : i32
    return %2, %c0_i32 : i32, i32
  }
  func.func @transform_3(%arg0: i32, %arg1: i32) -> (i32, i32, i32) {
    %c0_i32 = arith.constant 0 : i32
    %c0_i32_0 = arith.constant 0 : i32
    %c0_i32_1 = arith.constant 0 : i32
    return %arg0, %c0_i32, %c0_i32_0 : i32, i32, i32
  }
  func.func @transform_4(%arg0: i32, %arg1: i32) -> (i32, i32, i32) {
    %c0_i32 = arith.constant 0 : i32
    %c0_i32_0 = arith.constant 0 : i32
    %c0_i32_1 = arith.constant 0 : i32
    return %arg0, %c0_i32, %c0_i32_0 : i32, i32, i32
  }
  func.func @transform_5(%arg0: i32, %arg1: i32) -> (i32, i32, i32) {
    %c0_i32 = arith.constant 0 : i32
    %c0_i32_0 = arith.constant 0 : i32
    %c0_i32_1 = arith.constant 0 : i32
    return %arg0, %c0_i32, %c0_i32_0 : i32, i32, i32
  }
  func.func @transform_6(%arg0: i32, %arg1: i32) -> (i32, i32, i32) {
    %c0_i32 = arith.constant 0 : i32
    %c0_i32_0 = arith.constant 0 : i32
    %c0_i32_1 = arith.constant 0 : i32
    return %arg0, %c0_i32, %c0_i32_0 : i32, i32, i32
  }
}

</mosaic_0001>

<bundles_post_ra>
// kernel: _cm_loss_stats.1
= control target key start
LH: loop header
LB: loop body
LE: loop exit
PB: predicated region body
PF: predicated region fallthrough
CT: control target
= control target key end

     0   :  { %12 = vsyncpa [#allocation3], 0  ;;  %s2009_s0 = inlined_call_operand.vmem [shape: f32[500,128], index: 0, kind: input, shape index: {}]   ;;  %s2010_s1 = inlined_call_operand.hbm [shape: f32[500,128], index: 1, kind: input, shape index: {}]   ;;  %s2011_s2 = inlined_call_operand.vmem [shape: f32[500,16], index: 2, kind: input, shape index: {}]   ;;  %s2012_s3 = inlined_call_operand.hbm [shape: f32[1,1,128], index: 3, kind: output, shape index: {0}]   ;;  %s2013_s4 = inlined_call_operand.hbm [shape: f32[1,1,16], index: 4, kind: output, shape index: {1}]   ;;  %s2014_s5 = inlined_call_operand.hbm [shape: f32[1,1,16], index: 5, kind: output, shape index: {2}]   ;;  %s2015_s6 = inlined_call_operand.hbm [shape: f32[1,16,16], index: 6, kind: output, shape index: {3}]  }
   0x1   :  { %14 = vsyncpa [#allocation3 + $0x1], 0 }
   0x2   :  { %15 = vsyncpa [#allocation4], 0 }
   0x3   :  { %16 = vsyncpa [#allocation7], 0 }
   0x4   :  { %17 = vsyncpa [#allocation10], 0  ;;  %s1377_s21 = smov 0   ;;  %s1379_s22 = smov 0  }
   0x5   :  { %s1381_s23 = smov 0   ;;  %s1383_s24 = smov 0  }
   0x6   :  { %s1385_s25 = smov 0   ;;  %s1387_s26 = smov 0  }
   0x7 LB: > { %s32_s27 = sadd.s32 1, %s1326_s25  ;;  %p75_p1 = scmp.lt.s32.totalorder %s1326_s25, 3  ;;  %s1330_s26 = sphi %s1387_s26, %s23_s26   ;;  %s1326_s25 = sphi %s1385_s25, %s2026_s25   ;;  %s1322_s24 = sphi %s1383_s24, %s2025_s24   ;;  %s1318_s23 = sphi %s1381_s23, %s2024_s23   ;;  %s1314_s22 = sphi %s1379_s22, %s2023_s22   ;;  %s1310_s21 = sphi %s1377_s21, %s2022_s21  }
   0x8   : > { %p33_p0 = scmp.ge.s32.totalorder %s32_s27, 4  ;;  %s974_s28 = sadd.s32 4294967295, %s1330_s26  }
   0x9   : > { %p91_p2 = scmp.ne.s32.totalorder %s1318_s23, %s1314_s22  ;;  %p92_p4 = scmp.eq.s32.totalorder %s1330_s26, 0 }
   0xa   : > { %s2028_s27 = smov (%p33_p0, %s32_s27), 0  ;;  %p97_p5 = scmp.ne.s32.totalorder %s1314_s22, %s1310_s21 }
   0xb   : > { %s1413_s29 = scalar_select %p75_p1, %s1326_s25, 3 }
   0xc   : > { %p79_p3 = scmp.lt.s32.totalorder %s2028_s27, 3  ;;  %p98_p6 = scmp.eq.s32.totalorder %s974_s28, 0 }
   0xd   : > { %p93_p7 = por %p92_p4, %p91_p2  ;;  %s84_s9 = sadd.s32 1, %s1318_s23 }
   0xe   : > { %s80_s30 = scalar_select %p79_p3, %s2028_s27, 3 }
   0xf   : > { %p1421_p8 = por %p98_p6, %p97_p5  ;;  %p976_p10 = scmp.ge.s32.totalorder %s1330_s26, 4 }
  0x10   : > { %s81_s8 = ssub.s32 %s1413_s29, %s80_s30 }
  0x11   : > { %p82_p9 = scmp.eq.s32.totalorder %s81_s8, 0  ;;  %255 = sbr.rel (%p976_p10) target bundleno = 58 (0x3a), region = 16 }
  0x13   : > { %s1428_s10 = scalar_select %p82_p9, %s1318_s23, %s84_s9  }
  0x16   : > { %283 = sbr.rel (!%p93_p7) target bundleno = 58 (0x3a), region = 24  ;;  %s284_s11 = sand.u32 (%p93_p7), 1, %s1318_s23  }
  0x17   : > { %s978_s12 = sshll.u32 (%p93_p7), %s1413_s29, 4  ;;  %s977_s13 = sshll.u32 (%p93_p7), %s284_s11, 7 }
  0x18   : > { %s294_s14 = ssub.s32 (%p93_p7), 63, %s978_s12  ;;  %s1436_s18 = scalar_lea.sflag (%p93_p7), [#allocation3], %s284_s11 }
  0x19   : > { %p295_p11 = scmp.lt.s32.totalorder (%p93_p7), %s294_s14, 16  ;;  %s288_s19 = scalar_lea.vmem (%p93_p7), [#allocation2], %s977_s13 }
  0x1b   : > { %s2030_s14 = smov (!%p295_p11, %s294_s14), 16 }
  0x1c   : > { %s979_s15 = sshll.u32 %s2030_s14, 3 }
  0x1d   : > { %s298_s16 = ssub.s32 128, %s979_s15 }
  0x1e   : > { %s299_s17 = sshll.u32 %s298_s16, 4 }
  0x1f   : > { %300 = vsyncadd %s1436_s18, %s299_s17  ;;  %p1439_p12 = scmp.ne.s32.totalorder %s979_s15, 0  ;;  %s1018_s21 = sshll.u32 %s1413_s29, 7 }
  0x20   : > { %s303_s9 = scalar_lea.hbm %s2010_s1, %s1018_s21  ;;  %s1447_s12 = sshll.u32 %s288_s19, 4  ;;  %s308_s12 = int_to_ptr.vmem [resolvable:$true] %s1447_s12 }
  0x21   : > { %s305_s11 = sshll.u32 %s303_s9, 4  ;;  %s983_s13 = sshll.u32 %s2030_s14, 7  ;;  %s1450_s11 = int_to_ptr.hbm [resolvable:$true] %s305_s11 }
  0x22   : > { %s1117_s16 = sshra.s32 %s1450_s11, 4  ;;  %s1119_s15 = sshrl.u32 %s983_s13, 4  ;;  %s1118_s16 = int_to_ptr.hbm [resolvable:$true] %s1117_s16 }
  0x23   : > { %s1124_s17 = scalar_lea.hbm %s1118_s16, %s1119_s15  ;;  %s1128_s19 = scalar_lea.hbm %s2010_s1, 504 }
  0x24   : > { %p1125_p13 = scmp.ne.s32.totalorder %s1118_s16, %s1124_s17  ;;  %p1130_p2 = scmp.lt.s32.totalorder %s1128_s19, %s1124_s17 }
  0x26   : > { %p1126_p0 = pnand %p1125_p13, %p1439_p12 }
  0x28   : > { %p1127_p1 = pneg %p1126_p0 }
  0x2a   : > { %p1132_p3 = pnand %p1130_p2, %p1127_p1 }
  0x2c   : > { %1135 = shalt.err (!%p1132_p3)
}
  0x2d   : > { %s1136_s30 = sshra.s32 %s308_s12, 4  ;;  %s1332_s9 = smov [#allocation2]   ;;  %s1137_s30 = int_to_ptr.vmem [resolvable:$true] %s1136_s30 }
  0x2e   : > { %s1143_s8 = scalar_lea.vmem %s1137_s30, %s1119_s15  ;;  %s1147_s16 = scalar_lea.vmem %s1332_s9, 256 }
  0x2f   : > { %p1144_p4 = scmp.ne.s32.totalorder %s1137_s30, %s1143_s8  ;;  %p1149_p7 = scmp.lt.s32.totalorder %s1147_s16, %s1143_s8 }
  0x31   : > { %p1145_p5 = pnand %p1144_p4, %p1439_p12 }
  0x33   : > { %p1146_p6 = pneg %p1145_p5 }
  0x35   : > { %p1151_p9 = pnand %p1149_p7, %p1146_p6 }
  0x37   : > { %1154 = shalt.err (!%p1151_p9)
}
  0x38   : > { %s1333_s29 = smov 128   ;;  %s1334_s17 = smov 8  }
  0x39   : > { %313 = dma.hbm_to_vmem [thread:$0]  (%p1439_p12), %s1450_s11, %s983_s13, %s308_s12, %s1436_s18, %s1333_s29, %s1333_s29, %s1334_s17  }
  0x3a PF: > { %p984_p10 = scmp.ge.s32.totalorder %s1330_s26, 1  ;;  %p340_p11 = scmp.lt.s32.totalorder %s1330_s26, 5 }
  0x3c   : > { %p341_p13 = pnand %p984_p10, %p340_p11 }
  0x3d   : > { %s346_s15 = sand.u32 (!%p341_p13), 1, %s1314_s22  }
  0x3e   : > { %344 = sbr.rel (%p341_p13) target bundleno = 399 (0x18f), region = 32  ;;  %s985_s21 = sshll.u32 (!%p341_p13), %s346_s15, 7 }
  0x3f   : > { %s347_s19 = scalar_lea.sflag (!%p341_p13), [#allocation3], %s346_s15  ;;  %s1476_s30 = scalar_lea.vmem (!%p341_p13), [#allocation2], %s985_s21 }
  0x43   : > { %1293 = dma.done.wait (%p1421_p8), %s347_s19, 2048  }
  0x44   : > { %1295 = vsyncadd (%p1421_p8), %s347_s19, 4294965248  ;;  %p403_p12 = scmp.lt.s32.totalorder %s1322_s24, 3  ;;  %s990_s14 = sshll.u32 %s1322_s24, 7 }
  0x45   : > { %s457_s18 = ssub.s32 500, %s990_s14  ;;  %p991_p8 = scmp.ne.s32.totalorder %s1322_s24, 0 }
  0x46   : > { %s404_s20 = scalar_select %p403_p12, %s1322_s24, 3 }
  0x48   : > { %s986_s12 = sshll.u32 %s404_s20, 4 }
  0x49   : > { %p410_p0 = scmp.lt.s32.totalorder %s986_s12, 62  ;;  %461 = sbr.rel (%p991_p8) target bundleno = 84 (0x54), region = 40 }
  0x4b   : > { %s2032_s12 = smov (!%p410_p0, %s986_s12), 62 }
  0x4c   : > { %s987_s11 = sshll.u32 %s2032_s12, 3 }
  0x4d   : > { %s1488_s9 = scalar_lea.vmem %s2009_s0, %s987_s11  ;;  %s1493_s7 = scalar_lea.vmem %s2011_s2, %s987_s11 }
  0x4e   : > { %vm463_vm0 = vcmask 122880   ;;  %v1335_v0 = vmov 0.0   ;;  %vm466_vm1 = vcmask 130048  }
  0x4f   : > { %462 = vst [vmem:[#allocation5] sm:$0x1] %v1335_v0 }
  0x50   : > { %464 = vst.msk [vmem:[#allocation6] sm:$0x1] %vm463_vm0, %v1335_v0 }
  0x51   : > { %465 = vst.msk [vmem:[#allocation8] sm:$0x1] %vm463_vm0, %v1335_v0 }
  0x52   : > { %467 = vst.msk [vmem:[#allocation9] sm:$0xff] %vm466_vm1, %v1335_v0 }
  0x53   : > { %468 = vst.msk [vmem:[#allocation9 + $0x8] sm:$0xff] %vm466_vm1, %v1335_v0 }
  0x54 PF: > { %v469_v1 = vlaneseq  ;;  %v503_v2 = vld [vmem:[%s1488_s9] sm:$0xff]  ;;  %v1498_v4 = vstv %s457_s18  ;;  %v504_v5 = vld [vmem:[%s1488_s9 + $0x8] sm:$0xff]  ;;  %vm640_vm2 = vcmask 130048   ;;  %v505_v18 = vld [vmem:[%s1488_s9 + $0x10] sm:$0xff]  ;;  %p1953_p1 = scmp.eq.s32.totalorder %s974_s28, 3  ;;  %s1336_s17 = smov [#allocation6]  }
  0x55   : > { %v519_v3 = vld [vmem:[%s1476_s30] sm:$0xff]  ;;  %v520_v6 = vld [vmem:[%s1476_s30 + $0x8] sm:$0xff]  ;;  %v521_v19 = vld [vmem:[%s1476_s30 + $0x10] sm:$0xff]  ;;  %s818_s15 = sshll.u32 %s1336_s17, 4  ;;  %s1337_s14 = smov [#allocation5]   ;;  %s819_s15 = int_to_ptr.vmem [resolvable:$true] %s818_s15 }
  0x56   : > { %v1502_v7 = vshrl.u32 %v469_v1, 7  ;;  %v1505_v8 = vld [vmem:[%s1493_s7] sm:$0xff]  ;;  %v535_v9 = vsub.f32 %v503_v2, %v519_v3  ;;  %v536_v11 = vsub.f32 %v504_v5, %v520_v6  ;;  %v1513_v12 = vld [vmem:[%s1493_s7 + $0x8] sm:$0xff]  ;;  %v1531_v20 = vld [vmem:[%s1493_s7 + $0x10] sm:$0xff]  ;;  %v537_v29 = vsub.f32 %v505_v18, %v521_v19  ;;  %s805_s18 = sshll.u32 %s1337_s14, 4  ;;  %s807_s11 = sshll.u32 %s2012_s3, 4  ;;  %s806_s18 = int_to_ptr.vmem [resolvable:$true] %s805_s18  ;;  %s808_s11 = int_to_ptr.hbm [resolvable:$true] %s807_s11 }
  0x57   : > { %v506_v31 = vld [vmem:[%s1488_s9 + $0x18] sm:$0xff]  ;;  %v1564_v41 = vld [vmem:[%s1493_s7 + $0x20] sm:$0xff]  ;;  %v1599_v61 = vld [vmem:[%s1493_s7 + $0x28] sm:$0xff]  ;;  %s1338_s28 = smov [#allocation8]   ;;  %s833_s16 = sshll.u32 %s2014_s5, 4  ;;  %s834_s16 = int_to_ptr.hbm [resolvable:$true] %s833_s16 }
  0x58   : > { %vm2016_vm3 = vcmp.lt.s32.totalorder %v1502_v7, %v1498_v4  ;;  %v1510_v10 = vadd.s32 8, %v1502_v7  ;;  %v1516_v13 = vadd.s32 16, %v1502_v7  ;;  %v1523_v15 = vadd.s32 24, %v1502_v7  ;;  %v522_v32 = vld [vmem:[%s1476_s30 + $0x18] sm:$0xff]  ;;  %v507_v50 = vld [vmem:[%s1488_s9 + $0x20] sm:$0xff]  ;;  %v508_v3 = vld [vmem:[%s1488_s9 + $0x28] sm:$0xff] }
  0x59   : > { %v623_v14 = vsel %vm2016_vm3, %v1505_v8, 0.0  ;;  %v551_v21 = vsel %vm2016_vm3, %v535_v9, 0.0  ;;  %v1543_v23 = vadd.s32 32, %v1502_v7  ;;  %v1559_v33 = vld [vmem:[%s1493_s7 + $0x18] sm:$0xff]  ;;  %v538_v42 = vsub.f32 %v506_v31, %v522_v32  ;;  %v523_v51 = vld [vmem:[%s1476_s30 + $0x20] sm:$0xff]  ;;  %v524_v5 = vld [vmem:[%s1476_s30 + $0x28] sm:$0xff] }
  0x5a   : > { %v641_v16 = vsel %vm640_vm2, %v623_v14, 0.0  ;;  %v682_v17 = vmul.f32 %v623_v14, %v623_v14  ;;  %739 = vxpose.xlu0.b32.start [1/16] (narrow) %v623_v14, 16  ;;  %vm488_vm4 = vcmp.lt.s32.totalorder %v1510_v10, %v1498_v4  ;;  %vm489_vm5 = vcmp.lt.s32.totalorder %v1516_v13, %v1498_v4  ;;  %v1613_v6 = vld [vmem:[%s1493_s7 + $0x30] sm:$0xff]  ;;  %s831_s13 = sshll.u32 %s1338_s28, 4  ;;  %s1339_s29 = smov [#allocation9]   ;;  %s832_s13 = int_to_ptr.vmem [resolvable:$true] %s831_s13 }
  0x5b   : > { %v624_v22 = vsel %vm488_vm4, %v1513_v12, 0.0  ;;  %v552_v25 = vsel %vm488_vm4, %v536_v11, 0.0  ;;  %v625_v30 = vsel %vm489_vm5, %v1531_v20, 0.0  ;;  %vm490_vm6 = vcmp.lt.s32.totalorder %v1523_v15, %v1498_v4  ;;  %s847_s19 = sshll.u32 %s2015_s6, 4  ;;  %s848_s19 = int_to_ptr.hbm [resolvable:$true] %s847_s19 }
  0x5c   : > { %v698_v24 = vsel %vm640_vm2, %v682_v17, 0.0  ;;  %v642_v26 = vsel %vm640_vm2, %v624_v22, 0.0  ;;  %v683_v27 = vmul.f32 %v624_v22, %v624_v22  ;;  %v568_v34 = vmul.f32 %v551_v21, %v551_v21 }
  0x5d   : > { %v643_v28 = vadd.f32 %v642_v26, %v641_v16  ;;  %v644_v36 = vsel %vm640_vm2, %v625_v30, 0.0  ;;  %v569_v37 = vmul.f32 %v552_v25, %v552_v25  ;;  %v684_v40 = vmul.f32 %v625_v30, %v625_v30  ;;  %v509_v25 = vld [vmem:[%s1488_s9 + $0x30] sm:$0xff] }
  0x5e   : > { %v699_v35 = vsel %vm640_vm2, %v683_v27, 0.0  ;;  %v1570_v43 = vsel %vm490_vm6, %v1559_v33, 0.0  ;;  %vm491_vm7 = vcmp.lt.s32.totalorder %v1543_v23, %v1498_v4  ;;  %v553_v44 = vsel %vm489_vm5, %v537_v29, 0.0  ;;  %v525_v26 = vld [vmem:[%s1476_s30 + $0x30] sm:$0xff] }
  0x5f   : > { %v700_v38 = vadd.f32 %v699_v35, %v698_v24  ;;  %v645_v39 = vadd.f32 %v644_v36, %v643_v28  ;;  %v701_v45 = vsel %vm640_vm2, %v684_v40, 0.0  ;;  %v646_v46 = vsel %vm640_vm2, %v1570_v43, 0.0  ;;  %v510_v40 = vld [vmem:[%s1488_s9 + $0x38] sm:$0xff] }
  0x60   : > { %v685_v47 = vmul.f32 %v1570_v43, %v1570_v43  ;;  %v1588_v52 = vsel %vm491_vm7, %v1564_v41, 0.0  ;;  %v584_v53 = vadd.f32 %v569_v37, %v568_v34  ;;  %v570_v57 = vmul.f32 %v553_v44, %v553_v44  ;;  %v1647_v34 = vld [vmem:[%s1493_s7 + $0x38] sm:$0xff] }
  0x61   : > { %v702_v48 = vadd.f32 %v701_v45, %v700_v38  ;;  %v647_v49 = vadd.f32 %v646_v46, %v645_v39  ;;  %v648_v55 = vsel %vm640_vm2, %v1588_v52, 0.0  ;;  %v686_v56 = vmul.f32 %v1588_v52, %v1588_v52 }
  0x62   : > { %740 = vxpose.xlu0.b32.cont [2/16] (narrow) %v624_v22, 16  ;;  %v703_v54 = vsel %vm640_vm2, %v685_v47, 0.0  ;;  %v1596_v60 = vadd.s32 40, %v1502_v7  ;;  %v554_v62 = vsel %vm490_vm6, %v538_v42, 0.0  ;;  %v539_v63 = vsub.f32 %v507_v50, %v523_v51  ;;  %v526_v42 = vld [vmem:[%s1476_s30 + $0x38] sm:$0xff] }
  0x63   : > { %v704_v58 = vadd.f32 %v703_v54, %v702_v48  ;;  %v649_v59 = vadd.f32 %v648_v55, %v647_v49  ;;  %v705_v0 = vsel %vm640_vm2, %v686_v56, 0.0  ;;  %v1606_v1 = vadd.s32 48, %v1502_v7  ;;  %v511_v56 = vld [vmem:[%s1488_s9 + $0x40] sm:$0xff] }
  0x64   : > { %vm492_vm8 = vcmp.lt.s32.totalorder %v1596_v60, %v1498_v4  ;;  %v585_v11 = vadd.f32 %v584_v53, %v570_v57  ;;  %v571_v14 = vmul.f32 %v554_v62, %v554_v62  ;;  %v555_v18 = vsel %vm491_vm7, %v539_v63, 0.0  ;;  %v527_v57 = vld [vmem:[%s1476_s30 + $0x40] sm:$0xff] }
  0x65   : > { %v706_v2 = vadd.f32 %v705_v0, %v704_v58  ;;  %v1619_v9 = vsel %vm492_vm8, %v1599_v61, 0.0  ;;  %vm493_vm9 = vcmp.lt.s32.totalorder %v1606_v1, %v1498_v4  ;;  %v540_v19 = vsub.f32 %v508_v3, %v524_v5  ;;  %v1678_v58 = vld [vmem:[%s1493_s7 + $0x40] sm:$0xff] }
  0x66   : > { %v650_v16 = vsel %vm640_vm2, %v1619_v9, 0.0  ;;  %v687_v17 = vmul.f32 %v1619_v9, %v1619_v9  ;;  %v1634_v22 = vsel %vm493_vm9, %v1613_v6, 0.0  ;;  %v1644_v32 = vadd.s32 56, %v1502_v7 }
  0x67   : > { %v651_v21 = vadd.f32 %v650_v16, %v649_v59  ;;  %v652_v27 = vsel %vm640_vm2, %v1634_v22, 0.0  ;;  %v688_v28 = vmul.f32 %v1634_v22, %v1634_v22  ;;  %v572_v35 = vmul.f32 %v555_v18, %v555_v18 }
  0x68   : > { %v707_v24 = vsel %vm640_vm2, %v687_v17, 0.0  ;;  %v556_v37 = vsel %vm492_vm8, %v540_v19, 0.0  ;;  %v541_v38 = vsub.f32 %v509_v25, %v525_v26  ;;  %vm494_vm10 = vcmp.lt.s32.totalorder %v1644_v32, %v1498_v4  ;;  %v1706_v25 = vld [vmem:[%s1493_s7 + $0x48] sm:$0xff] }
  0x69   : > { %v708_v29 = vadd.f32 %v707_v24, %v706_v2  ;;  %v653_v31 = vadd.f32 %v652_v27, %v651_v21  ;;  %v709_v36 = vsel %vm640_vm2, %v688_v28, 0.0  ;;  %v1661_v44 = vsel %vm494_vm10, %v1647_v34, 0.0  ;;  %v512_v21 = vld [vmem:[%s1488_s9 + $0x48] sm:$0xff] }
  0x6a   : > { %741 = vxpose.xlu0.b32.cont [3/16] (narrow) %v625_v30, 16  ;;  %v586_v30 = vadd.f32 %v585_v11, %v571_v14  ;;  %v654_v45 = vsel %vm640_vm2, %v1661_v44, 0.0  ;;  %v689_v46 = vmul.f32 %v1661_v44, %v1661_v44  ;;  %v573_v48 = vmul.f32 %v556_v37, %v556_v37  ;;  %v528_v24 = vld [vmem:[%s1476_s30 + $0x48] sm:$0xff] }
  0x6b   : > { %v710_v39 = vadd.f32 %v709_v36, %v708_v29  ;;  %v655_v49 = vadd.f32 %v654_v45, %v653_v31  ;;  %v557_v50 = vsel %vm493_vm9, %v541_v38, 0.0  ;;  %v542_v51 = vsub.f32 %v510_v40, %v526_v42  ;;  %v513_v42 = vld [vmem:[%s1488_s9 + $0x50] sm:$0xff] }
  0x6c   : > { %v587_v47 = vadd.f32 %v586_v30, %v572_v35  ;;  %v711_v53 = vsel %vm640_vm2, %v689_v46, 0.0  ;;  %v1673_v55 = vadd.s32 64, %v1502_v7  ;;  %v574_v62 = vmul.f32 %v557_v50, %v557_v50  ;;  %v529_v45 = vld [vmem:[%s1476_s30 + $0x50] sm:$0xff] }
  0x6d   : > { %v712_v54 = vadd.f32 %v711_v53, %v710_v39  ;;  %v543_v63 = vsub.f32 %v511_v56, %v527_v57  ;;  %v1701_v19 = vadd.s32 72, %v1502_v7  ;;  %v544_v26 = vsub.f32 %v512_v21, %v528_v24  ;;  %v1731_v46 = vld [vmem:[%s1493_s7 + $0x50] sm:$0xff] }
  0x6e   : > { %v588_v59 = vadd.f32 %v587_v47, %v573_v48  ;;  %vm495_vm11 = vcmp.lt.s32.totalorder %v1673_v55, %v1498_v4  ;;  %v1726_v40 = vadd.s32 80, %v1502_v7  ;;  %v545_v47 = vsub.f32 %v513_v42, %v529_v45 }
  0x6f   : > { %v1689_v0 = vsel %vm495_vm11, %v1678_v58, 0.0  ;;  %v559_v17 = vsel %vm495_vm11, %v543_v63, 0.0  ;;  %vm496_vm12 = vcmp.lt.s32.totalorder %v1701_v19, %v1498_v4  ;;  %v530_v63 = vld [vmem:[%s1476_s30 + $0x58] sm:$0xff] }
  0x70   : > { %v656_v2 = vsel %vm640_vm2, %v1689_v0, 0.0  ;;  %v690_v3 = vmul.f32 %v1689_v0, %v1689_v0  ;;  %v589_v11 = vadd.f32 %v588_v59, %v574_v62  ;;  %v576_v28 = vmul.f32 %v559_v17, %v559_v17 }
  0x71   : > { %v657_v5 = vadd.f32 %v656_v2, %v655_v49  ;;  %v1717_v29 = vsel %vm496_vm12, %v1706_v25, 0.0  ;;  %vm497_vm13 = vcmp.lt.s32.totalorder %v1726_v40, %v1498_v4  ;;  %v1751_v62 = vadd.s32 88, %v1502_v7  ;;  %v1756_v2 = vld [vmem:[%s1493_s7 + $0x58] sm:$0xff] }
  0x72   : > { %742 = vxpose.xlu0.b32.cont [4/16] (narrow) %v1570_v43, 16  ;;  %v558_v43 = vsel %vm494_vm10, %v542_v51, 0.0  ;;  %v713_v16 = vsel %vm640_vm2, %v690_v3, 0.0  ;;  %v658_v31 = vsel %vm640_vm2, %v1717_v29, 0.0  ;;  %v691_v30 = vmul.f32 %v1717_v29, %v1717_v29 }
  0x73   : > { %v575_v14 = vmul.f32 %v558_v43, %v558_v43  ;;  %v714_v18 = vadd.f32 %v713_v16, %v712_v54  ;;  %v659_v35 = vadd.f32 %v658_v31, %v657_v5  ;;  %v561_v49 = vsel %vm497_vm13, %v545_v47, 0.0  ;;  %v514_v43 = vld [vmem:[%s1488_s9 + $0x58] sm:$0xff] }
  0x74   : > { %v715_v38 = vsel %vm640_vm2, %v691_v30, 0.0  ;;  %v578_v50 = vmul.f32 %v561_v49, %v561_v49  ;;  %v546_v3 = vsub.f32 %v514_v43, %v530_v63  ;;  %vm498_vm14 = vcmp.lt.s32.totalorder %v1751_v62, %v1498_v4  ;;  %v532_v49 = vld [vmem:[%s1476_s30 + $0x68] sm:$0xff]  ;;  %v681_v62 = vld [vmem:[#allocation8] sm:$0x1] }
  0x75   : > { %v590_v27 = vadd.f32 %v589_v11, %v575_v14  ;;  %v716_v39 = vadd.f32 %v715_v38, %v714_v18  ;;  %v483_v47 = vadd.s32 104, %v1502_v7 }
  0x76   : > { %v562_v5 = vsel %vm498_vm14, %v546_v3, 0.0 }
  0x77   : > { %v591_v36 = vadd.f32 %v590_v27, %v576_v28  ;;  %v579_v11 = vmul.f32 %v562_v5, %v562_v5  ;;  %v515_v27 = vld [vmem:[%s1488_s9 + $0x60] sm:$0xff]  ;;  %vm500_vm0 = vcmp.lt.s32.totalorder %v483_v47, %v1498_v4  ;;  %v484_v5 = vadd.s32 112, %v1502_v7  ;;  %v738_v47 = vld [vmem:[#allocation9 + $0x8] sm:$0xff] }
  0x78   : > { %v531_v28 = vld [vmem:[%s1476_s30 + $0x60] sm:$0xff] }
  0x79   : > { %v547_v31 = vsub.f32 %v515_v27, %v531_v28  ;;  %vm501_vm1 = vcmp.lt.s32.totalorder %v484_v5, %v1498_v4 }
  0x7a   : > { %743 = vxpose.xlu0.b32.cont [5/16] (narrow) %v1588_v52, 16  ;;  %v560_v52 = vsel %vm496_vm12, %v544_v26, 0.0  ;;  %v1776_v26 = vadd.s32 96, %v1502_v7 }
  0x7b   : > { %v577_v37 = vmul.f32 %v560_v52, %v560_v52  ;;  %v1781_v52 = vld [vmem:[%s1493_s7 + $0x60] sm:$0xff] }
  0x7c   : > { %vm499_vm15 = vcmp.lt.s32.totalorder %v1776_v26, %v1498_v4  ;;  %v737_v26 = vld [vmem:[#allocation9] sm:$0xff] }
  0x7d   : > { %v592_v48 = vadd.f32 %v591_v36, %v577_v37  ;;  %v563_v30 = vsel %vm499_vm15, %v547_v31, 0.0 }
  0x7f   : > { %v593_v56 = vadd.f32 %v592_v48, %v578_v50  ;;  %v516_v48 = vld [vmem:[%s1488_s9 + $0x68] sm:$0xff] }
  0x80   : > { %v620_v50 = vld [vmem:[%s1493_s7 + $0x68] sm:$0xff] }
  0x81   : > { %v594_v18 = vadd.f32 %v593_v56, %v579_v11  ;;  %v517_v11 = vld [vmem:[%s1488_s9 + $0x70] sm:$0xff] }
  0x82   : > { %744 = vxpose.xlu0.b32.cont [6/16] (narrow) %v1619_v9, 16  ;;  %v1742_v9 = vsel %vm497_vm13, %v1731_v46, 0.0 }
  0x83   : > { %v660_v51 = vsel %vm640_vm2, %v1742_v9, 0.0  ;;  %v692_v53 = vmul.f32 %v1742_v9, %v1742_v9 }
  0x84   : > { %v661_v54 = vadd.f32 %v660_v51, %v659_v35  ;;  %v580_v35 = vmul.f32 %v563_v30, %v563_v30  ;;  %v548_v51 = vsub.f32 %v516_v48, %v532_v49 }
  0x85   : > { %v717_v57 = vsel %vm640_vm2, %v692_v53, 0.0 }
  0x86   : > { %v718_v59 = vadd.f32 %v717_v57, %v716_v39  ;;  %v595_v39 = vadd.f32 %v594_v18, %v580_v35  ;;  %v564_v53 = vsel %vm500_vm0, %v548_v51, 0.0 }
  0x87   : > { %v581_v56 = vmul.f32 %v564_v53, %v564_v53 }
  0x89   : > { %v596_v43 = vadd.f32 %v595_v39, %v581_v56  ;;  %v622_v39 = vld [vmem:[%s1493_s7 + $0x78] sm:$0xff] }
  0x8a   : > { %745 = vxpose.xlu0.b32.cont [7/16] (narrow) %v1634_v22, 16  ;;  %v1767_v22 = vsel %vm498_vm14, %v1756_v2, 0.0 }
  0x8b   : > { %v662_v14 = vsel %vm640_vm2, %v1767_v22, 0.0  ;;  %v693_v16 = vmul.f32 %v1767_v22, %v1767_v22 }
  0x8c   : > { %v663_v17 = vadd.f32 %v662_v14, %v661_v54  ;;  %v1809_v54 = vsel %vm500_vm0, %v620_v50, 0.0  ;;  %v533_v14 = vld [vmem:[%s1476_s30 + $0x70] sm:$0xff] }
  0x8d   : > { %v719_v21 = vsel %vm640_vm2, %v693_v16, 0.0  ;;  %v695_v57 = vmul.f32 %v1809_v54, %v1809_v54  ;;  %v621_v16 = vld [vmem:[%s1493_s7 + $0x70] sm:$0xff]  ;;  %s845_s7 = sshll.u32 %s1339_s29, 4  ;;  %s846_s7 = int_to_ptr.vmem [resolvable:$true] %s845_s7 }
  0x8e   : > { %v720_v24 = vadd.f32 %v719_v21, %v718_v59  ;;  %v637_v21 = vsel %vm501_vm1, %v621_v16, 0.0 }
  0x8f   : > { %v723_v63 = vsel %vm640_vm2, %v695_v57, 0.0  ;;  %v696_v27 = vmul.f32 %v637_v21, %v637_v21 }
  0x91   : > { %v725_v30 = vsel %vm640_vm2, %v696_v27, 0.0 }
  0x92   : > { %746 = vxpose.xlu0.b32.cont [8/16] (narrow) %v1661_v44, 16  ;;  %v1792_v44 = vsel %vm499_vm15, %v1781_v52, 0.0 }
  0x93   : > { %v664_v36 = vsel %vm640_vm2, %v1792_v44, 0.0  ;;  %v694_v37 = vmul.f32 %v1792_v44, %v1792_v44 }
  0x94   : > { %v665_v38 = vadd.f32 %v664_v36, %v663_v17  ;;  %v549_v17 = vsub.f32 %v517_v11, %v533_v14  ;;  %v485_v36 = vadd.s32 120, %v1502_v7 }
  0x95   : > { %v721_v42 = vsel %vm640_vm2, %v694_v37, 0.0  ;;  %v518_v37 = vld [vmem:[%s1488_s9 + $0x78] sm:$0xff] }
  0x96   : > { %v722_v45 = vadd.f32 %v721_v42, %v720_v24  ;;  %v565_v18 = vsel %vm501_vm1, %v549_v17, 0.0  ;;  %vm502_vm3 = vcmp.lt.s32.totalorder %v485_v36, %v1498_v4 }
  0x97   : > { %v582_v24 = vmul.f32 %v565_v18, %v565_v18  ;;  %v638_v48 = vsel %vm502_vm3, %v622_v39, 0.0  ;;  %992 = vmatpush.msk.msra.mxu0 %vm502_vm3, %v622_v39  ;;  %1019 = vmatpush.msk.msra.mxu1 %vm502_vm3, %v622_v39 }
  0x98   : > { %v724_v3 = vadd.f32 %v723_v63, %v722_v45  ;;  %v670_v51 = vsel %vm640_vm2, %v638_v48, 0.0  ;;  %v697_v53 = vmul.f32 %v638_v48, %v638_v48 }
  0x99   : > { %v597_v31 = vadd.f32 %v596_v43, %v582_v24  ;;  %993 = vmatpush.msk.msra.mxu0 %vm501_vm1, %v621_v16  ;;  %1020 = vmatpush.msk.msra.mxu1 %vm501_vm1, %v621_v16 }
  0x9a   : > { %747 = vxpose.xlu0.b32.cont [9/16] (narrow) %v1689_v0, 16  ;;  %v666_v0 = vsel %vm640_vm2, %v1809_v54, 0.0  ;;  %v726_v35 = vadd.f32 %v725_v30, %v724_v3 }
  0x9b   : > { %v667_v59 = vadd.f32 %v666_v0, %v665_v38  ;;  %v534_v38 = vld [vmem:[%s1476_s30 + $0x78] sm:$0xff]  ;;  %v727_v0 = vsel %vm640_vm2, %v697_v53, 0.0  ;;  %994 = vmatpush.msk.msra.mxu0 %vm500_vm0, %v620_v50  ;;  %1021 = vmatpush.msk.msra.mxu1 %vm500_vm0, %v620_v50  ;;  %s820_s30 = sshll.u32 %s2013_s4, 4  ;;  %s821_s30 = int_to_ptr.hbm [resolvable:$true] %s820_s30 }
  0x9c   : > { %v550_v42 = vsub.f32 %v518_v37, %v534_v38  ;;  %v728_v57 = vadd.f32 %v727_v0, %v726_v35 }
  0x9d   : > { %995 = vmatpush.msk.msra.mxu0 %vm499_vm15, %v1781_v52  ;;  %1022 = vmatpush.msk.msra.mxu1 %vm499_vm15, %v1781_v52 }
  0x9e   : > { %v566_v45 = vsel %vm502_vm3, %v550_v42, 0.0  ;;  %vm2019_vm3 = vcmp.lt.s32.totalorder %v1502_v7, %v1498_v4  ;;  %v729_v10 = vrot.slane %v728_v57, 4 }
  0x9f   : > { %v583_v49 = vmul.f32 %v566_v45, %v566_v45  ;;  %996 = vmatpush.msk.msra.mxu0 %vm498_vm14, %v1756_v2  ;;  %1023 = vmatpush.msk.msra.mxu1 %vm498_vm14, %v1756_v2 }
  0xa0   : > { %v730_v23 = vadd.f32 %v729_v10, %v728_v57 }
  0xa1   : > { %997 = vmatpush.msk.msra.mxu0 %vm497_vm13, %v1731_v46  ;;  %1024 = vmatpush.msk.msra.mxu1 %vm497_vm13, %v1731_v46  ;;  %v567_v46 = vld [vmem:[#allocation5] sm:$0x1] }
  0xa2   : > { %748 = vxpose.xlu0.b32.cont [10/16] (narrow) %v1717_v29, 16  ;;  %v668_v29 = vsel %vm640_vm2, %v637_v21, 0.0 }
  0xa3   : > { %v669_v28 = vadd.f32 %v668_v29, %v667_v59  ;;  %998 = vmatpush.msk.msra.mxu0 %vm496_vm12, %v1706_v25  ;;  %1025 = vmatpush.msk.msra.mxu1 %vm496_vm12, %v1706_v25 }
  0xa5   : > { %v671_v56 = vadd.f32 %v670_v51, %v669_v28  ;;  %999 = vmatpush.msk.msra.mxu0 %vm495_vm11, %v1678_v58  ;;  %1026 = vmatpush.msk.msra.mxu1 %vm495_vm11, %v1678_v58  ;;  %v639_v58 = vld [vmem:[#allocation6] sm:$0x1] }
  0xa7   : > { %1000 = vmatpush.msk.msra.mxu0 %vm494_vm10, %v1647_v34  ;;  %1027 = vmatpush.msk.msra.mxu1 %vm494_vm10, %v1647_v34 }
  0xa9   : > { %1001 = vmatpush.msk.msra.mxu0 %vm493_vm9, %v1613_v6  ;;  %1028 = vmatpush.msk.msra.mxu1 %vm493_vm9, %v1613_v6 }
  0xaa   : > { %749 = vxpose.xlu0.b32.cont [11/16] (narrow) %v1742_v9, 16  ;;  %v598_v9 = vadd.f32 %v597_v31, %v583_v49 }
  0xab   : > { %1002 = vmatpush.msk.msra.mxu0 %vm492_vm8, %v1599_v61  ;;  %1029 = vmatpush.msk.msra.mxu1 %vm492_vm8, %v1599_v61 }
  0xac   : > { %v599_v60 = vrot.slane %v598_v9, 4 }
  0xad   : > { %1003 = vmatpush.msk.msra.mxu0 %vm491_vm7, %v1564_v41  ;;  %1030 = vmatpush.msk.msra.mxu1 %vm491_vm7, %v1564_v41  ;;  %v731_v41 = vrot.slane %v730_v23, 2 }
  0xae   : > { %v600_v61 = vadd.f32 %v599_v60, %v598_v9 }
  0xaf   : > { %1004 = vmatpush.msk.msra.mxu0 %vm490_vm6, %v1559_v33  ;;  %1031 = vmatpush.msk.msra.mxu1 %vm490_vm6, %v1559_v33  ;;  %v732_v6 = vadd.f32 %v731_v41, %v730_v23 }
  0xb0   : > { %v601_v32 = vrot.slane %v600_v61, 2 }
  0xb1   : > { %1005 = vmatpush.msk.msra.mxu0 %vm489_vm5, %v1531_v20  ;;  %1032 = vmatpush.msk.msra.mxu1 %vm489_vm5, %v1531_v20  ;;  %vm2020_vm5 = vmmov %vm2019_vm3  ;;  %v672_v20 = vrot.slane %v671_v56, 4 }
  0xb2   : > { %750 = vxpose.xlu0.b32.cont [12/16] (narrow) %v1767_v22, 16  ;;  %v602_v34 = vadd.f32 %v601_v32, %v600_v61 }
  0xb3   : > { %1006 = vmatpush.msk.msra.mxu0 %vm488_vm4, %v1513_v12  ;;  %1033 = vmatpush.msk.msra.mxu1 %vm488_vm4, %v1513_v12  ;;  %v673_v12 = vadd.f32 %v672_v20, %v671_v56  ;;  %vm679_vm4 = vcmask 122880  }
  0xb4   : > { %v603_v7 = vrot.slane %v602_v34, 1 }
  0xb5   : > { %1007 = vmatpush.msk.msra.mxu0 %vm2019_vm3, %v1505_v8  ;;  %1034 = vmatpush.msk.msra.mxu1 %vm2020_vm5, %v1505_v8  ;;  %v674_v33 = vrot.slane %v673_v12, 2  ;;  %v733_v8 = vrot.slane %v732_v6, 1 }
  0xb6   : > { %v604_v19 = vadd.f32 %v603_v7, %v602_v34 }
  0xb7   : > { %v675_v1 = vadd.f32 %v674_v33, %v673_v12  ;;  %v734_v25 = vadd.f32 %v733_v8, %v732_v6 }
  0xb8   : > { %v605_v2 = vadd.f32 %v604_v19, %v567_v46 }
  0xb9   : > { %v676_v4 = vrot.slane %v675_v1, 1  ;;  %v735_v22 = vadd.f32 %v734_v25, %v681_v62 }
  0xba   : > { %751 = vxpose.xlu0.b32.cont [13/16] (narrow) %v1792_v44, 16  ;;  %606 = vst [vmem:[#allocation5] sm:$0x1] %v605_v2 }
  0xbb   : > { %v677_v55 = vadd.f32 %v676_v4, %v675_v1  ;;  %1037 = dma.vmem_to_hbm [thread:$0]  (%p1953_p1), %s806_s18, 16, %s808_s11, [#allocation4]   ;;  %736 = vst.msk [vmem:[#allocation8] sm:$0x1] %vm679_vm4, %v735_v22 }
  0xbd   : > { %v678_v40 = vadd.f32 %v677_v55, %v639_v58 }
  0xbf   : > { %680 = vst.msk [vmem:[#allocation6] sm:$0x1] %vm679_vm4, %v678_v40 }
  0xc0   : > { %1039 = dma.vmem_to_hbm [thread:$0]  (%p1953_p1), %s819_s15, 16, %s821_s30, [#allocation7]  }
  0xc1   : > { %1041 = dma.vmem_to_hbm [thread:$0]  (%p1953_p1), %s832_s13, 16, %s834_s16, [#allocation7]  }
  0xc2   : > { %752 = vxpose.xlu0.b32.cont [14/16] (narrow) %v1809_v54, 16  ;;  %s1340_s15 = smov 128   ;;  %s1341_s30 = smov 8  }
  0xca   : > { %753 = vxpose.xlu0.b32.cont [15/16] (narrow) %v637_v21, 16 }
  0xd2   : > { %754 = vxpose.xlu0.b32.end [16/16] (narrow) %v638_v48, 16 }
  0xfe   : > { %v755_v13 = vpop.trf.xlu0 }
  0xff   : > { %787 = vmatmul.f32.vlgmr.msra.gmra.mxu0 %v755_v13 }
 0x106   : > { %v756_v15 = vpop.trf.xlu0 }
 0x107   : > { %790 = vmatmul.f32.vlgmr.msra.gmra.mxu1 %v756_v15 }
 0x17c   : > { %v788_v52 = vpop.f32.mrf.mxu0 }
 0x17d   : > { %v794_v44 = vadd.f32 %v788_v52, %v737_v26 }
 0x17f   : > { %796 = vst.msk [vmem:[#allocation9] sm:$0xff] %vm640_vm2, %v794_v44 }
 0x184   : > { %v791_v50 = vpop.f32.mrf.mxu1 }
 0x185   : > { %v795_v54 = vadd.f32 %v791_v50, %v738_v47 }
 0x187   : > { %797 = vst.msk [vmem:[#allocation9 + $0x8] sm:$0xff] %vm640_vm2, %v795_v54 }
 0x188   : > { %1043 = dma.vmem_to_hbm [thread:$0]  (%p1953_p1), %s846_s7, 256, %s848_s19, [#allocation10], %s1340_s15, %s1340_s15, %s1341_s30  }
 0x189   : > { %1297 = dma.done.wait (%p1953_p1), [#allocation4], 16  }
 0x18a   : > { %1299 = vsyncadd (%p1953_p1), [#allocation4], 4294967280 }
 0x18b   : > { %1301 = dma.done.wait (%p1953_p1), [#allocation7], 32  }
 0x18c   : > { %1303 = vsyncadd (%p1953_p1), [#allocation7], 4294967264 }
 0x18d   : > { %1305 = dma.done.wait (%p1953_p1), [#allocation10], 256  }
 0x18e   : > { %1307 = vsyncadd (%p1953_p1), [#allocation10], 4294967040 }
 0x18f PF: > { %s23_s26 = sadd.s32 1, %s1330_s26   ;;  %s2022_s21 = smov %s1314_s22 }
 0x190   : > { %p20_p2 = scmp.ge.s32.totalorder %s23_s26, 6   ;;  %s2023_s22 = smov %s1318_s23 }
 0x191   : > { %s2024_s23 = smov %s1428_s10  ;;  %s2025_s24 = smov %s1326_s25 }
 0x192   : > { %s2026_s25 = smov %s2028_s27  ;;  %22 = sbr.rel (!%p20_p2) target bundleno = 7 (0x7), region = 107 }
 0x197   :  { %879 = vsyncpa [#allocation3], 1 }
 0x198   :  { %881 = vsyncpa [#allocation3 + $0x1], 1 }
 0x199   :  { %882 = vsyncpa [#allocation4], 1 }
 0x19a   :  { %884 = vsyncpa [#allocation4 + $0x1], 1 }
 0x19b   :  { %885 = vsyncpa [#allocation7], 1 }
 0x19c   :  { %886 = vsyncpa [#allocation10], 1 }

</bundles_post_ra>
